<compile_context>
chip_gen: v6e
topology: v6e:2x2x1
jax: 0.10.0
libtpu: 0.0.40
codegen_flags: <defaults>
</compile_context>

<pallas_src>
import numpy as np
import jax
import jax.numpy as jnp
from jax.experimental import pallas as pl
from jax.experimental.pallas import tpu as pltpu


# ----------------------------------------------------------------------------
# Basis construction (exactly mirrors the PyTorch TrendBasis / SeasonalityBasis)
# ----------------------------------------------------------------------------
def trend_basis(degree_of_polynomial, backcast_size, forecast_size):
    poly_size = degree_of_polynomial + 1
    total = np.concatenate(
        [np.power(np.arange(forecast_size + backcast_size, dtype=np.float64)
                  / (forecast_size + backcast_size), i)[None, :]
         for i in range(poly_size)]
    ).astype(np.float32) ** 0.75
    return total[:, :backcast_size], total[:, backcast_size:]   # (P, T), (P, F)


def seasonality_basis(harmonics, backcast_size, forecast_size):
    freq = np.append(
        np.zeros(1, dtype=np.float32),
        np.arange(harmonics, harmonics / 2 * (forecast_size + backcast_size),
                  dtype=np.float32) / harmonics)[None, :]
    tgrid = np.arange(backcast_size + forecast_size, dtype=np.float32)[:, None] \
        / (forecast_size + backcast_size)
    total = -2 * np.pi * tgrid * freq
    total2 = -2 * np.pi * tgrid * freq - (-0.25 * np.pi * freq)
    bc, fc = total[:backcast_size], total[backcast_size:]
    bc2, fc2 = total2[:backcast_size], total2[backcast_size:]
    back = np.concatenate(
        [np.cos(bc).T, np.sin(bc).T, np.cos(bc2).T, np.sin(bc2).T], axis=0)
    fore = np.concatenate(
        [np.cos(fc).T, np.sin(fc).T, np.cos(fc2).T, np.sin(fc2).T], axis=0)
    return back.astype(np.float32), fore.astype(np.float32)   # (4Nf, T), (4Nf, F)


# ----------------------------------------------------------------------------
# Offline folding of the fully-linear 2-block network.
#   back = base + res @ Ab + cb ,  fore = base + res @ Af + cf ,  res = x - base
# collapses (base = x[:, T-1]) to:
#   back = x @ Ab_fold + cb ,  fore = x @ Af_fold + cf
# The kernel uses the transposed (lane-dense) form:
#   back (T, m) = Wb @ x_t + cb ,  fore (F, m) = Wf @ x_t + cf
#   Wb = Ab_fold.T (T, T),  Wf = Af_fold.T (F, T),  cb (T, 1),  cf (F, 1)
# ----------------------------------------------------------------------------
def fold_params(p, T):
    eye = jnp.eye(T, dtype=jnp.float32)
    A1 = p["w1"] @ p["wo1"]
    c1 = p["b1"] @ p["wo1"] + p["bo1"]
    A2 = p["w2"] @ p["wo2"]
    c2 = p["b2"] @ p["wo2"] + p["bo2"]

    AB1, AF1 = A1 @ p["bb1"], A1 @ p["bf1"]
    cB1, cF1 = c1 @ p["bb1"], c1 @ p["bf1"]
    AB2, AF2 = A2 @ p["bb2"], A2 @ p["bf2"]
    cB2, cF2 = c2 @ p["bb2"], c2 @ p["bf2"]

    R = eye - AB1                                   # residual propagation
    Ab = AB1 + R @ AB2                              # (T, T)
    Af = AF1 + R @ AF2                              # (T, F)
    cb = cB1 + cB2 - cB1 @ AB2                      # (1, T)
    cf = cF1 + cF2 - cB1 @ AF2                      # (1, F)

    # fold "base = last timestep" (out = base + (x - base) @ A + c):
    Ab_fold = Ab.at[T - 1, :].add(1.0 - Ab.sum(axis=0))
    Af_fold = Af.at[T - 1, :].add(1.0 - Af.sum(axis=0))
    return {"wb": Ab_fold.T, "wf": Af_fold.T,        # (T, T), (F, T)  f32 resident
            "cb": cb.T, "cf": cf.T}                  # (T, 1), (F, 1)  f32 resident


# ----------------------------------------------------------------------------
# Pallas kernel: two MXU matmuls + bias add per lane-dense tile.
#   x_ref  : (T, m_tile)   lane-dense input slab (series on lanes)
#   wb_ref : (T, T)        folded backcast weight, resident f32
#   wf_ref : (F, T)        folded forecast weight, resident f32
#   cb_ref : (T, 1)        folded backcast bias (lane-broadcast add; VPU filler
#   cf_ref : (F, 1)        fully hidden under the HBM bound)
#   back_ref/fore_ref : (T, m_tile) / (F, m_tile) lane-dense outputs
# ----------------------------------------------------------------------------
def nbeats_kernel(x_ref, wb_ref, wf_ref, cb_ref, cf_ref, back_ref, fore_ref):
    x = x_ref[...]
    back = jnp.dot(wb_ref[...], x, preferred_element_type=jnp.float32) + cb_ref[...]
    fore = jnp.dot(wf_ref[...], x, preferred_element_type=jnp.float32) + cf_ref[...]
    back_ref[...] = back.astype(back_ref.dtype)
    fore_ref[...] = fore.astype(fore_ref.dtype)


def _choose_tiling(M, T, F, in_bytes, out_bytes,
                   vmem_tile_budget=12 * 1024 * 1024, m_tile_cap=32768):
    """Pick (m_tile, n_steps).

    Tiles are sized as large as the VMEM budget allows (the kernel is HBM-bound
    and per-grid-step overhead ~0.35us dominates small tiles).  The step count
    is chosen first and kept even when >1 (balanced work for v7x's two
    TensorCores under "parallel"); m_tile is then derived so lane padding
    stays below 2 vregs even with very large tiles.
    """
    m128 = max(128, pl.cdiv(M, 128) * 128)
    # double-buffered input tile + two double-buffered output tiles, per lane
    per_lane = 2 * T * in_bytes + 2 * (T + F) * out_bytes
    m_max = max(128, min(m_tile_cap, (vmem_tile_budget // per_lane) // 128 * 128))
    n_steps = pl.cdiv(m128, m_max)
    if n_steps > 1 and n_steps % 2:
        n_steps += 1
    m_tile = pl.cdiv(pl.cdiv(m128, n_steps), 128) * 128
    return m_tile, n_steps


def nbeats_forward(x, folded, *, m_tile=None, compute_dtype=jnp.float32,
                   out_dtype=jnp.float32, kernel_layout=False):
    """x: (B, T, C) float32.

    Default returns (forecast (B,C,F), forecast_back (B,C,T)) like the PyTorch
    module.  With kernel_layout=True the raw lane-dense kernel outputs
    (fore (F, m_pad), back (T, m_pad), M) are returned so the consumer can fuse
    the final transpose instead of paying an extra HBM pass here.
    """
    B, T, C = x.shape
    Wb, Wf = folded["wb"], folded["wf"]           # (T, T), (F, T) f32
    cb, cf = folded["cb"], folded["cf"]           # (T, 1), (F, 1) f32
    F = Wf.shape[0]
    M = B * C

    in_bytes = jnp.dtype(compute_dtype).itemsize
    out_bytes = jnp.dtype(out_dtype).itemsize
    if m_tile is None:
        m_tile, n_steps = _choose_tiling(M, T, F, in_bytes, out_bytes)
    else:
        n_steps = pl.cdiv(max(128, pl.cdiv(M, 128) * 128), m_tile)
    m_pad = n_steps * m_tile

    # Series axis on lanes -> lane-dense DMA + unmasked stores.  The transpose,
    # pad and cast below are flagged for input fusion so they ride the Pallas
    # input DMA instead of materializing a second copy of x in HBM.
    xt = jnp.transpose(x, (1, 0, 2)).reshape(T, M)
    if m_pad != M:
        xt = jnp.pad(xt, ((0, 0), (0, m_pad - M)))
    xt = xt.astype(compute_dtype)

    back, fore = pl.pallas_call(
        nbeats_kernel,
        grid=(n_steps,),
        in_specs=[pl.BlockSpec((T, m_tile), lambda i: (0, i)),
                  pl.BlockSpec((T, T), lambda i: (0, 0)),
                  pl.BlockSpec((F, T), lambda i: (0, 0)),
                  pl.BlockSpec((T, 1), lambda i: (0, 0)),
                  pl.BlockSpec((F, 1), lambda i: (0, 0))],
        out_specs=(pl.BlockSpec((T, m_tile), lambda i: (0, i)),
                   pl.BlockSpec((F, m_tile), lambda i: (0, i))),
        out_shape=(jax.ShapeDtypeStruct((T, m_pad), out_dtype),
                   jax.ShapeDtypeStruct((F, m_pad), out_dtype)),
        compiler_params=pltpu.CompilerParams(
            dimension_semantics=("parallel",),
            allow_input_fusion=[True, False, False, False, False],
            vmem_limit_bytes=32 * 1024 * 1024),
    )(xt, Wb, Wf, cb, cf)

    if kernel_layout:
        # Columns >= M are padding (bias-only garbage); consumer must slice.
        return fore, back, M

    fore_bcf = fore[:, :M].T.reshape(B, C, F).astype(jnp.float32)
    back_bct = back[:, :M].T.reshape(B, C, T).astype(jnp.float32)
    return fore_bcf, back_bct


# ----------------------------------------------------------------------------
# Pure-JAX reference (same math as the PyTorch forward, variation=False,
# unfolded -- validates both the folding and the kernel).
# ----------------------------------------------------------------------------
def nbeats_reference(x, p):
    xp = jnp.transpose(x, (0, 2, 1))               # (B, C, T)
    base = xp[:, :, -1:]
    res = xp - base
    fore = base
    back_total = base
    for blk in ("1", "2"):
        h = res @ p["w" + blk] + p["b" + blk]
        theta = h @ p["wo" + blk] + p["bo" + blk]
        back = jnp.einsum("bkp,pt->bkt", theta, p["bb" + blk])
        f = jnp.einsum("bkp,pt->bkt", theta, p["bf" + blk])
        back_total = back_total + back
        res = res - back
        fore = fore + f
    return fore, back_total


# ----------------------------------------------------------------------------
# Parameter init (deterministic, synthetic)
# ----------------------------------------------------------------------------
def make_params(key, input_size, output_size, n_polynomials, n_harmonics):
    # Block 1 (trend): hidden = 2*(P+1), theta_dim = P+1
    H1 = 2 * (n_polynomials + 1)
    P1 = n_polynomials + 1
    bb1, bf1 = trend_basis(n_polynomials, input_size, output_size)

    # Block 2 (seasonality): hidden = theta_dim = 4 * num_freq
    bb2, bf2 = seasonality_basis(n_harmonics, input_size, output_size)
    P2 = bb2.shape[0]
    H2 = P2

    ks = jax.random.split(key, 4)
    scale = 0.1

    def lin(k, fan_in, fan_out):
        kw, kb = jax.random.split(k)
        w = scale * jax.random.normal(kw, (fan_in, fan_out), jnp.float32)
        b = scale * jax.random.normal(kb, (1, fan_out), jnp.float32)
        return w, b

    w1, b1 = lin(ks[0], input_size, H1)
    wo1, bo1 = lin(ks[1], H1, P1)
    w2, b2 = lin(ks[2], input_size, H2)
    wo2, bo2 = lin(ks[3], H2, P2)

    return {
        "w1": w1, "b1": b1, "wo1": wo1, "bo1": bo1,
        "bb1": jnp.asarray(bb1), "bf1": jnp.asarray(bf1),
        "w2": w2, "b2": b2, "wo2": wo2, "bo2": bo2,
        "bb2": jnp.asarray(bb2), "bf2": jnp.asarray(bf2),
    }
    # TODO(synk): variation=True (VAE sampling / KL) and InstanceNorm/Dropout
    # branches are training-time stochastic paths and are not implemented.


if __name__ == "__main__":
    # Small, deterministic config consistent with the module:
    B, C = 2, 4                 # batch, channel (number of series)
    input_size = 16             # x_t_n_inputs (backcast length)
    output_size = 8             # forecast horizon
    n_polynomials = 2
    n_harmonics = 1

    key = jax.random.PRNGKey(0)
    kx, kp = jax.random.split(key)
    x = jax.random.normal(kx, (B, input_size, C), jnp.float32)

    params = make_params(kp, input_size, output_size, n_polynomials, n_harmonics)
    folded = fold_params(params, input_size)

    # f32 path (default): strict correctness check against the unfolded reference.
    fore, back = nbeats_forward(x, folded)
    jax.block_until_ready((fore, back))

    fore_ref, back_ref = nbeats_reference(x, params)
    assert fore.shape == (B, C, output_size) and back.shape == (B, C, input_size)
    np.testing.assert_allclose(np.asarray(fore), np.asarray(fore_ref),
                               rtol=1e-4, atol=1e-4)
    np.testing.assert_allclose(np.asarray(back), np.asarray(back_ref),
                               rtol=1e-4, atol=1e-4)

    # bf16 streamed-input + bf16-store path (valid on v5e/v6e/v7x: MXU is
    # bf16-native on all three; weights stay resident in f32, accum is f32).
    fore_bf, back_bf = nbeats_forward(x, folded, compute_dtype=jnp.bfloat16,
                                      out_dtype=jnp.bfloat16)
    jax.block_until_ready((fore_bf, back_bf))
    np.testing.assert_allclose(np.asarray(fore_bf), np.asarray(fore_ref),
                               rtol=5e-2, atol=5e-2)
    np.testing.assert_allclose(np.asarray(back_bf), np.asarray(back_ref),
                               rtol=5e-2, atol=5e-2)

    print("KERNEL_OK")
</pallas_src>

<mosaic_0001>
module attributes {stable_mosaic.version = 11 : i64} {
  func.func @nbeats_kernel(%arg0: i32, %arg1: memref<16x128xf32, #tpu.memory_space<vmem>>, %arg2: memref<16x16xf32, #tpu.memory_space<vmem>>, %arg3: memref<8x16xf32, #tpu.memory_space<vmem>>, %arg4: memref<16x1xf32, #tpu.memory_space<vmem>>, %arg5: memref<8x1xf32, #tpu.memory_space<vmem>>, %arg6: memref<16x128xf32, #tpu.memory_space<vmem>>, %arg7: memref<8x128xf32, #tpu.memory_space<vmem>>) attributes {dimension_semantics = [#tpu.dimension_semantics<parallel>], iteration_bounds = array<i64: 1>, scalar_prefetch = 0 : i64, scratch_operands = 0 : i64, tpu.core_type = #tpu.core_type<tc>, window_params = [{transform_indices = @transform_0, window_bounds = array<i64: 16, 128>}, {pipeline_mode = #tpu.pipeline_mode<synchronous>, transform_indices = @transform_1, window_bounds = array<i64: 16, 16>}, {pipeline_mode = #tpu.pipeline_mode<synchronous>, transform_indices = @transform_2, window_bounds = array<i64: 8, 16>}, {pipeline_mode = #tpu.pipeline_mode<synchronous>, transform_indices = @transform_3, window_bounds = array<i64: 16, 1>}, {pipeline_mode = #tpu.pipeline_mode<synchronous>, transform_indices = @transform_4, window_bounds = array<i64: 8, 1>}, {transform_indices = @transform_5, window_bounds = array<i64: 16, 128>}, {transform_indices = @transform_6, window_bounds = array<i64: 8, 128>}]} {
    %c0 = arith.constant 0 : index
    %c0_0 = arith.constant 0 : index
    %0 = vector.load %arg1[%c0, %c0_0] : memref<16x128xf32, #tpu.memory_space<vmem>>, vector<16x128xf32>
    %c0_1 = arith.constant 0 : index
    %c0_2 = arith.constant 0 : index
    %1 = vector.load %arg2[%c0_1, %c0_2] : memref<16x16xf32, #tpu.memory_space<vmem>>, vector<16x16xf32>
    %cst = arith.constant dense<0.000000e+00> : vector<16x128xf32>
    %2 = tpu.matmul %1, %0, %cst {dimension_numbers = #tpu.dot_dimension_numbers<[1], [0], [0], [1], [0, 0, 1, 1], [], []>} : vector<16x16xf32>, vector<16x128xf32>, vector<16x128xf32> -> vector<16x128xf32>
    %c0_3 = arith.constant 0 : index
    %c0_4 = arith.constant 0 : index
    %3 = vector.load %arg4[%c0_3, %c0_4] : memref<16x1xf32, #tpu.memory_space<vmem>>, vector<16x1xf32>
    %4 = vector.broadcast %3 : vector<16x1xf32> to vector<16x128xf32>
    %5 = arith.addf %2, %4 : vector<16x128xf32>
    %c0_5 = arith.constant 0 : index
    %c0_6 = arith.constant 0 : index
    %6 = vector.load %arg3[%c0_5, %c0_6] : memref<8x16xf32, #tpu.memory_space<vmem>>, vector<8x16xf32>
    %cst_7 = arith.constant dense<0.000000e+00> : vector<8x128xf32>
    %7 = tpu.matmul %6, %0, %cst_7 {dimension_numbers = #tpu.dot_dimension_numbers<[1], [0], [0], [1], [0, 0, 1, 1], [], []>} : vector<8x16xf32>, vector<16x128xf32>, vector<8x128xf32> -> vector<8x128xf32>
    %c0_8 = arith.constant 0 : index
    %c0_9 = arith.constant 0 : index
    %8 = vector.load %arg5[%c0_8, %c0_9] : memref<8x1xf32, #tpu.memory_space<vmem>>, vector<8x1xf32>
    %9 = vector.broadcast %8 : vector<8x1xf32> to vector<8x128xf32>
    %10 = arith.addf %7, %9 : vector<8x128xf32>
    %c0_10 = arith.constant 0 : index
    %c0_11 = arith.constant 0 : index
    %11 = vector.load %arg6[%c0_10, %c0_11] : memref<16x128xf32, #tpu.memory_space<vmem>>, vector<16x128xf32>
    tpu.vector_store %arg6[%c0_10, %c0_11], %5 {strides = array<i32>} : memref<16x128xf32, #tpu.memory_space<vmem>>, vector<16x128xf32>,
    %c0_12 = arith.constant 0 : index
    %c0_13 = arith.constant 0 : index
    %12 = vector.load %arg7[%c0_12, %c0_13] : memref<8x128xf32, #tpu.memory_space<vmem>>, vector<8x128xf32>
    tpu.vector_store %arg7[%c0_12, %c0_13], %10 {strides = array<i32>} : memref<8x128xf32, #tpu.memory_space<vmem>>, vector<8x128xf32>,
    return
  }
  func.func @transform_0(%arg0: i32) -> (i32, i32) {
    %c0_i32 = arith.constant 0 : i32
    %c0_i32_0 = arith.constant 0 : i32
    return %c0_i32, %arg0 : i32, i32
  }
  func.func @transform_1(%arg0: i32) -> (i32, i32) {
    %c0_i32 = arith.constant 0 : i32
    %c0_i32_0 = arith.constant 0 : i32
    %c0_i32_1 = arith.constant 0 : i32
    return %c0_i32, %c0_i32_0 : i32, i32
  }
  func.func @transform_2(%arg0: i32) -> (i32, i32) {
    %c0_i32 = arith.constant 0 : i32
    %c0_i32_0 = arith.constant 0 : i32
    %c0_i32_1 = arith.constant 0 : i32
    return %c0_i32, %c0_i32_0 : i32, i32
  }
  func.func @transform_3(%arg0: i32) -> (i32, i32) {
    %c0_i32 = arith.constant 0 : i32
    %c0_i32_0 = arith.constant 0 : i32
    %c0_i32_1 = arith.constant 0 : i32
    return %c0_i32, %c0_i32_0 : i32, i32
  }
  func.func @transform_4(%arg0: i32) -> (i32, i32) {
    %c0_i32 = arith.constant 0 : i32
    %c0_i32_0 = arith.constant 0 : i32
    %c0_i32_1 = arith.constant 0 : i32
    return %c0_i32, %c0_i32_0 : i32, i32
  }
  func.func @transform_5(%arg0: i32) -> (i32, i32) {
    %c0_i32 = arith.constant 0 : i32
    %c0_i32_0 = arith.constant 0 : i32
    return %c0_i32, %arg0 : i32, i32
  }
  func.func @transform_6(%arg0: i32) -> (i32, i32) {
    %c0_i32 = arith.constant 0 : i32
    %c0_i32_0 = arith.constant 0 : i32
    return %c0_i32, %arg0 : i32, i32
  }
}

</mosaic_0001>

<bundles_post_ra>
// kernel: tpu_custom_call.1
= control target key start
LH: loop header
LB: loop body
LE: loop exit
PB: predicated region body
PF: predicated region fallthrough
CT: control target
= control target key end

     0   :  { %12 = vsyncpa [#allocation3], 0  ;;  %s426_s0 = inlined_call_operand.vmem [shape: f32[16,128], index: 0, kind: input, shape index: {}]   ;;  %s427_s1 = inlined_call_operand.hbm [shape: f32[16,16], index: 1, kind: input, shape index: {}]   ;;  %s428_s2 = inlined_call_operand.vmem [shape: f32[8,16], index: 2, kind: input, shape index: {}]   ;;  %s429_s3 = inlined_call_operand.vmem [shape: f32[16,1], index: 3, kind: input, shape index: {}]   ;;  %s430_s4 = inlined_call_operand.vmem [shape: f32[8,1], index: 4, kind: input, shape index: {}]   ;;  %s431_s5 = inlined_call_operand.hbm [shape: f32[16,128], index: 5, kind: output, shape index: {0}]   ;;  %s432_s6 = inlined_call_operand.hbm [shape: f32[8,128], index: 6, kind: output, shape index: {1}]  }
   0x1   :  { %13 = vsyncpa [#allocation4], 0 }
   0x2   :  { %14 = vsyncpa [#allocation7], 0  ;;  %s350_s21 = smov [#allocation2]  }
   0x3   :  { %s22_s22 = sshll.u32 %s350_s21, 4  ;;  %s23_s22 = int_to_ptr.vmem [resolvable:$true] %s22_s22 }
   0x4   :  { %s292_s23 = scalar_lea.vmem %s23_s22, 256  ;;  %p297_p1 = scmp.lt.s32.totalorder %s23_s22, %s23_s22 }
   0x5   :  { %p293_p0 = scmp.ne.s32.totalorder %s23_s22, %s292_s23  ;;  %p298_p2 = scmp.lt.s32.totalorder %s292_s23, %s292_s23 }
   0x7   :  { %p299_p3 = por %p298_p2, %p297_p1 }
   0x9   :  { %p300_p4 = pnand %p299_p3, %p293_p0 }
   0xb   :  { %303 = shalt.err (!%p300_p4)
}
   0xc   :  { %s351_s24 = smov 128   ;;  %s352_s25 = smov 8  }
   0xd   :  { %28 = dma.hbm_to_vmem [thread:$0]  %s427_s1, 256, %s23_s22, [#allocation3], %s351_s24, %s351_s24, %s352_s25  }
   0xe   :  { %344 = dma.done.wait [#allocation3], 256  }
   0xf   :  { %345 = vsyncadd [#allocation3], 4294967040  ;;  %v353_v0 = vmov 0.0   ;;  %vm354_vm0 = vmmov 0   ;;  %v355_v1 = vmov 0   ;;  %v39_v2 = vld [vmem:[%s426_s0 + $0x8] sm:$0xff] }
  0x10   :  { %267 = vmatprep.subr.mxu1 %v353_v0  ;;  %271 = vmatprep.mubr.msk.f32.mxu1 %vm354_vm0, %v353_v0  ;;  %v38_v3 = vld [vmem:[%s426_s0] sm:$0xff]  ;;  %vm54_vm1 = vcmask 130048   ;;  %v41_v5 = vld [vmem:[#allocation2 + $0x8] sm:$0xff]  ;;  %s357_s15 = smov [#allocation5]  }
  0x11   :  { %282 = vset.pattern.permute.xlu0 %v355_v1  ;;  %283 = vset.pattern.permute.xlu1 %v355_v1  ;;  %v40_v4 = vld [vmem:[#allocation2] sm:$0xff]  ;;  %v43_v9 = vld [vmem:[%s429_s3 + $0x8] sm:$0xff] }
  0x12   :  { %260 = vmatprep.subr.mxu0 %v39_v2  ;;  %268 = vmatpush3.msra.mxu1 %v39_v2  ;;  %v136_v6 = vld [vmem:[%s428_s2] sm:$0xff]  ;;  %s356_s2 = smov [#allocation6]  }
  0x13   :  { %261 = vmatpush3.msra.mxu0 %v39_v2  ;;  %269 = vmatprep.subr.mxu1 %v353_v0  ;;  %v42_v7 = vld [vmem:[%s429_s3] sm:$0xff]  ;;  %s237_s14 = sshll.u32 %s356_s2, 4  ;;  %s238_s14 = int_to_ptr.vmem [resolvable:$true] %s237_s14 }
  0x14   :  { %262 = vmatprep.subr.mxu0 %v38_v3  ;;  %264 = vmatprep.mubr.msk.f32.mxu0 %vm54_vm1, %v40_v4  ;;  %v137_v8 = vld [vmem:[%s430_s4] sm:$0xff]  ;;  %s224_s4 = sshll.u32 %s357_s15, 4  ;;  %s304_s3 = scalar_lea.vmem %s238_s14, 128  ;;  %s225_s4 = int_to_ptr.vmem [resolvable:$true] %s224_s4 }
  0x15   :  { %263 = vmatpush3.msra.mxu0 %v38_v3  ;;  %270 = vmatpush3.msra.mxu1 %v38_v3  ;;  %p305_p5 = scmp.ne.s32.totalorder %s238_s14, %s304_s3  ;;  %p309_p6 = scmp.lt.s32.totalorder %s238_s14, %s238_s14 }
  0x16   :  { %265 = vmatmul.mubr.msk.f32.vlgmr.msra.gmra.mxu0 %vm54_vm1, %v41_v5  ;;  %272 = vmatmul.mubr.msk.f32.vlgmr.msra.gmra.mxu1 %vm54_vm1, %v136_v6  ;;  %p310_p7 = scmp.lt.s32.totalorder %s304_s3, %s304_s3 }
  0x17   :  { %46 = vperm.xlu0 %282, %v42_v7   ;;  %140 = vperm.xlu1 %283, %v137_v8  }
  0x18   :  { %p311_p8 = por %p310_p7, %p309_p6 }
  0x1a   :  { %p312_p9 = pnand %p311_p8, %p305_p5 }
  0x1b   :  { %51 = vperm.xlu0 %282, %v43_v9  }
  0x92   :  { %v47_v10 = vpop.permute.xlu0 %46  ;;  %v141_v11 = vpop.permute.xlu1 %140 }
  0x96   :  { %v52_v12 = vpop.permute.xlu0 %51 }
  0xd6   :  { %v266_v13 = vpop.f32.mrf.mxu0  ;;  %v212_v14 = vpop.f32.mrf.mxu1 }
  0xd7   :  { %v133_v15 = vadd.f32 %v266_v13, %v52_v12  ;;  %v213_v16 = vadd.f32 %v212_v14, %v141_v11 }
  0xd8   :  { %v127_v17 = vpop.f32.mrf.mxu0  ;;  %v273_v18 = vpop.f32.mrf.mxu1 }
  0xd9   :  { %217 = vst [vmem:[#allocation5 + $0x8] sm:$0xff] %v133_v15  ;;  %218 = vst [vmem:[#allocation6] sm:$0xff] %v213_v16  ;;  %v128_v19 = vadd.f32 %v127_v17, %v47_v10 }
  0xda   :  { %315 = shalt.err (!%p312_p9)
}
  0xdb   :  { %240 = dma.vmem_to_hbm [thread:$0]  %s238_s14, 128, %s432_s6, [#allocation7]   ;;  %216 = vst [vmem:[#allocation5] sm:$0xff] %v128_v19 }
  0xdc   :  { %s324_s18 = scalar_lea.vmem %s225_s4, 256  ;;  %p329_p11 = scmp.lt.s32.totalorder %s225_s4, %s225_s4 }
  0xdd   :  { %p325_p10 = scmp.ne.s32.totalorder %s225_s4, %s324_s18  ;;  %p330_p12 = scmp.lt.s32.totalorder %s324_s18, %s324_s18 }
  0xdf   :  { %p331_p13 = por %p330_p12, %p329_p11 }
  0xe1   :  { %p332_p0 = pnand %p331_p13, %p325_p10 }
  0xe3   :  { %335 = shalt.err (!%p332_p0)
}
  0xe4   :  { %230 = dma.vmem_to_hbm [thread:$0]  %s225_s4, 256, %s431_s5, [#allocation4], %s351_s24, %s351_s24, %s352_s25  }
  0xe5   :  { %346 = dma.done.wait [#allocation4], 256  }
  0xe6   :  { %347 = vsyncadd [#allocation4], 4294967040 }
  0xe7   :  { %348 = dma.done.wait [#allocation7], 128  }
  0xe8   :  { %349 = vsyncadd [#allocation7], 4294967168 }
  0xe9   :  { %247 = vsyncpa [#allocation3], 1 }
  0xea   :  { %248 = vsyncpa [#allocation4], 1 }
  0xeb   :  { %249 = vsyncpa [#allocation7], 1 }

</bundles_post_ra>
